<compile_context>
chip_gen: v5e
topology: v5e:2x2
jax: 0.10.0
libtpu: 0.0.40
codegen_flags: <defaults>
</compile_context>

<pallas_src>
import math
from functools import partial

import jax
import jax.numpy as jnp
from jax.experimental import pallas as pl
from jax.experimental.pallas import tpu as pltpu

EPS = 1e-5  # BatchNorm2d default eps


def _round_up(x, m):
    return (x + m - 1) // m * m


# ---------------- Pass 1: GEMM + per-channel sum / sum-of-squares ---------------- #
def _stats_kernel(patches_ref, w_ref, sum_ref, sumsq_ref):
    @pl.when(pl.program_id(0) == 0)
    def _():
        sum_ref[...] = jnp.zeros_like(sum_ref)
        sumsq_ref[...] = jnp.zeros_like(sumsq_ref)

    # (TILE_M, KKC) bf16 x (KKC, Cp) bf16 -> f32 on the MXU
    y = jnp.dot(patches_ref[...], w_ref[...], preferred_element_type=jnp.float32)
    sum_ref[...] += jnp.sum(y, axis=0, keepdims=True)
    sumsq_ref[...] += jnp.sum(y * y, axis=0, keepdims=True)


# ---------------- Pass 2: GEMM + folded BN affine + folded PReLU ---------------- #
def _apply_kernel(patches_ref, w_ref, scale_ref, shift_ref, nscale_ref,
                  nshift_ref, out_ref, *, linear):
    y = jnp.dot(patches_ref[...], w_ref[...], preferred_element_type=jnp.float32)
    pos = y * scale_ref[...] + shift_ref[...]          # == (y - mean)*rsqrt(var+eps)*gamma + beta
    if linear:
        out_ref[...] = pos.astype(out_ref.dtype)
    else:
        neg = y * nscale_ref[...] + nshift_ref[...]    # == alpha * pos (folded)
        out_ref[...] = jnp.where(pos > 0, pos, neg).astype(out_ref.dtype)


def conv_block_forward(x_nchw, weight_oihw, gamma, beta, alpha, *, k, s, p,
                       linear=False, tile_m=1024):
    """Forward pass of ConvBlock (dw=False). x_nchw: (N, Cin, H, W)."""
    N, Cin, H, W = x_nchw.shape
    Cout = weight_oihw.shape[0]
    Ho = (H + 2 * p - k) // s + 1
    Wo = (W + 2 * p - k) // s + 1
    M = N * Ho * Wo
    KKC = k * k * Cin
    Cp = _round_up(max(Cout, 128), 128)          # lane-dense padded channel count

    # ---- glue: NCHW -> NHWC, pad, im2col (ordering (kh, kw, Cin)), cast to bf16 ----
    x = jnp.transpose(x_nchw, (0, 2, 3, 1))                        # NHWC
    xp = jnp.pad(x, ((0, 0), (p, p), (p, p), (0, 0)))
    cols = []
    for kh in range(k):
        for kw in range(k):
            cols.append(xp[:, kh:kh + (Ho - 1) * s + 1:s,
                              kw:kw + (Wo - 1) * s + 1:s, :])      # (N,Ho,Wo,Cin)
    patches = jnp.stack(cols, axis=3).reshape(M, KKC)              # (M, k*k*Cin)

    # Tile / pad M so the grid divides evenly (padded rows are zero -> contribute 0 to stats).
    tm = min(tile_m, _round_up(M, 8))
    Mp = _round_up(M, tm)
    if Mp != M:
        patches = jnp.pad(patches, ((0, Mp - M), (0, 0)))
    patches = patches.astype(jnp.bfloat16)
    grid_m = Mp // tm

    # weight (Cout, Cin, kh, kw) -> (kh, kw, Cin, Cout) -> (KKC, Cp) bf16, zero-padded channels
    w_mat = jnp.transpose(weight_oihw, (2, 3, 1, 0)).reshape(KKC, Cout)
    w_mat = jnp.pad(w_mat, ((0, 0), (0, Cp - Cout))).astype(jnp.bfloat16)

    patch_bytes = Mp * KKC * 2
    w_bytes = KKC * Cp * 2
    gemm_flops = 2 * Mp * KKC * Cp

    # ---------------- pass 1: batch statistics ---------------- #
    sums, sumsqs = pl.pallas_call(
        _stats_kernel,
        out_shape=(jax.ShapeDtypeStruct((1, Cp), jnp.float32),
                   jax.ShapeDtypeStruct((1, Cp), jnp.float32)),
        grid=(grid_m,),
        in_specs=[
            pl.BlockSpec((tm, KKC), lambda i: (i, 0)),   # streamed / pipelined
            pl.BlockSpec((KKC, Cp), lambda i: (0, 0)),   # resident weight
        ],
        out_specs=(pl.BlockSpec((1, Cp), lambda i: (0, 0)),   # resident accumulators
                   pl.BlockSpec((1, Cp), lambda i: (0, 0))),
        compiler_params=pltpu.CompilerParams(
            dimension_semantics=("arbitrary",)),
        cost_estimate=pl.CostEstimate(
            flops=gemm_flops, transcendentals=0,
            bytes_accessed=patch_bytes + w_bytes + 2 * Cp * 4),
    )(patches, w_mat)

    # ---- glue: fold BN affine (+ PReLU alpha) into per-channel scale/shift vectors ----
    mean = sums[0] / M                                            # real M, not padded
    var = jnp.maximum(sumsqs[0] / M - mean * mean, 0.0)           # biased variance (PyTorch BN)
    inv = jax.lax.rsqrt(var + EPS)
    gamma_p = jnp.pad(gamma.astype(jnp.float32), (0, Cp - Cout))
    beta_p = jnp.pad(beta.astype(jnp.float32), (0, Cp - Cout))
    alpha_p = jnp.pad(alpha.astype(jnp.float32), (0, Cp - Cout))
    scale = gamma_p * inv
    shift = beta_p - mean * scale
    nscale = (alpha_p * scale).reshape(1, Cp)
    nshift = (alpha_p * shift).reshape(1, Cp)
    scale = scale.reshape(1, Cp)
    shift = shift.reshape(1, Cp)

    # ---------------- pass 2: normalize + PReLU ---------------- #
    out_flat = pl.pallas_call(
        partial(_apply_kernel, linear=linear),
        out_shape=jax.ShapeDtypeStruct((Mp, Cp), jnp.float32),
        grid=(grid_m,),
        in_specs=[
            pl.BlockSpec((tm, KKC), lambda i: (i, 0)),
            pl.BlockSpec((KKC, Cp), lambda i: (0, 0)),
            pl.BlockSpec((1, Cp), lambda i: (0, 0)),
            pl.BlockSpec((1, Cp), lambda i: (0, 0)),
            pl.BlockSpec((1, Cp), lambda i: (0, 0)),
            pl.BlockSpec((1, Cp), lambda i: (0, 0)),
        ],
        out_specs=pl.BlockSpec((tm, Cp), lambda i: (i, 0)),
        compiler_params=pltpu.CompilerParams(
            dimension_semantics=("parallel",)),
        cost_estimate=pl.CostEstimate(
            flops=gemm_flops + 4 * Mp * Cp, transcendentals=0,
            bytes_accessed=patch_bytes + w_bytes + 4 * Cp * 4 + Mp * Cp * 4),
    )(patches, w_mat, scale, shift, nscale, nshift)

    # back to PyTorch NCHW convention (drop padded rows / channels)
    out = out_flat[:M, :Cout].reshape(N, Ho, Wo, Cout)
    return jnp.transpose(out, (0, 3, 1, 2))


def reference_forward(x_nchw, weight_oihw, gamma, beta, alpha, *, k, s, p,
                      linear=False):
    """Plain-JAX f32 reference matching PyTorch ConvBlock.forward (training-mode BN)."""
    y = jax.lax.conv_general_dilated(
        x_nchw, weight_oihw, window_strides=(s, s),
        padding=[(p, p), (p, p)],
        dimension_numbers=("NCHW", "OIHW", "NCHW"))
    mean = jnp.mean(y, axis=(0, 2, 3), keepdims=True)
    var = jnp.mean((y - mean) ** 2, axis=(0, 2, 3), keepdims=True)
    y_hat = (y - mean) / jnp.sqrt(var + EPS)
    y_hat = y_hat * gamma.reshape(1, -1, 1, 1) + beta.reshape(1, -1, 1, 1)
    if linear:
        return y_hat
    a = alpha.reshape(1, -1, 1, 1)
    return jnp.where(y_hat > 0, y_hat, a * y_hat)


if __name__ == "__main__":
    # ConvBlock(inp=4, oup=8, k=3, s=1, p=1, dw=False, linear=False)
    N, Cin, H, W = 2, 4, 16, 16
    Cout, K, S, P = 8, 3, 1, 1

    key = jax.random.PRNGKey(0)
    k_x, k_w, k_g, k_b = jax.random.split(key, 4)

    x = jax.random.normal(k_x, (N, Cin, H, W), dtype=jnp.float32)

    # Conv2d default init: kaiming_uniform(a=sqrt(5)) -> U(-1/sqrt(fan_in), 1/sqrt(fan_in))
    fan_in = Cin * K * K
    bound = 1.0 / math.sqrt(fan_in)
    weight = jax.random.uniform(k_w, (Cout, Cin, K, K), minval=-bound,
                                maxval=bound, dtype=jnp.float32)

    # BatchNorm affine params (perturbed from default 1/0 to exercise the math)
    gamma = 1.0 + 0.1 * jax.random.normal(k_g, (Cout,), dtype=jnp.float32)
    beta = 0.1 * jax.random.normal(k_b, (Cout,), dtype=jnp.float32)
    # PReLU default init: 0.25 per channel
    alpha = jnp.full((Cout,), 0.25, dtype=jnp.float32)

    out = conv_block_forward(x, weight, gamma, beta, alpha,
                             k=K, s=S, p=P, linear=False)
    out = jax.block_until_ready(out)

    ref = reference_forward(x, weight, gamma, beta, alpha,
                            k=K, s=S, p=P, linear=False)
    ref = jax.block_until_ready(ref)

    assert out.shape == (N, Cout, H, W), out.shape
    # Kernel feeds the MXU bf16 (f32 accumulation); validate vs. f32 reference with a
    # tolerance that accounts for bf16 input rounding.
    max_diff = float(jnp.max(jnp.abs(out - ref)))
    assert jnp.allclose(out, ref, atol=2e-2, rtol=2e-2), max_diff

    print("KERNEL_OK")
</pallas_src>

<mosaic_0001>
module attributes {stable_mosaic.version = 11 : i64} {
  func.func @_stats_kernel(%arg0: i32, %arg1: memref<512x36xbf16, #tpu.memory_space<vmem>>, %arg2: memref<36x128xbf16, #tpu.memory_space<vmem>>, %arg3: memref<1x128xf32, #tpu.memory_space<vmem>>, %arg4: memref<1x128xf32, #tpu.memory_space<vmem>>) attributes {dimension_semantics = [#tpu.dimension_semantics<arbitrary>], iteration_bounds = array<i64: 1>, scalar_prefetch = 0 : i64, scratch_operands = 0 : i64, tpu.core_type = #tpu.core_type<tc>, window_params = [{transform_indices = @transform_0, window_bounds = array<i64: 512, 36>}, {pipeline_mode = #tpu.pipeline_mode<synchronous>, transform_indices = @transform_1, window_bounds = array<i64: 36, 128>}, {pipeline_mode = #tpu.pipeline_mode<synchronous>, transform_indices = @transform_2, window_bounds = array<i64: 1, 128>}, {pipeline_mode = #tpu.pipeline_mode<synchronous>, transform_indices = @transform_3, window_bounds = array<i64: 1, 128>}]} {
    %c0_i32 = arith.constant 0 : i32
    %0 = arith.cmpi eq, %arg0, %c0_i32 : i32
    %1 = arith.extui %0 : i1 to i32
    %c0_i32_0 = arith.constant 0 : i32
    %2 = arith.cmpi ne, %1, %c0_i32_0 : i32
    scf.if %2 {
      %cst_14 = arith.constant 0.000000e+00 : f32
      %17 = vector.broadcast %cst_14 : f32 to vector<1x128xf32>
      %c0_15 = arith.constant 0 : index
      %c0_16 = arith.constant 0 : index
      %18 = vector.load %arg3[%c0_15, %c0_16] : memref<1x128xf32, #tpu.memory_space<vmem>>, vector<1x128xf32>
      tpu.vector_store %arg3[%c0_15, %c0_16], %17 {strides = array<i32>} : memref<1x128xf32, #tpu.memory_space<vmem>>, vector<1x128xf32>,
      %cst_17 = arith.constant 0.000000e+00 : f32
      %19 = vector.broadcast %cst_17 : f32 to vector<1x128xf32>
      %c0_18 = arith.constant 0 : index
      %c0_19 = arith.constant 0 : index
      %20 = vector.load %arg4[%c0_18, %c0_19] : memref<1x128xf32, #tpu.memory_space<vmem>>, vector<1x128xf32>
      tpu.vector_store %arg4[%c0_18, %c0_19], %19 {strides = array<i32>} : memref<1x128xf32, #tpu.memory_space<vmem>>, vector<1x128xf32>,
    } else {
    }
    %c0 = arith.constant 0 : index
    %c0_1 = arith.constant 0 : index
    %3 = vector.load %arg1[%c0, %c0_1] : memref<512x36xbf16, #tpu.memory_space<vmem>>, vector<512x36xbf16>
    %c0_2 = arith.constant 0 : index
    %c0_3 = arith.constant 0 : index
    %4 = vector.load %arg2[%c0_2, %c0_3] : memref<36x128xbf16, #tpu.memory_space<vmem>>, vector<36x128xbf16>
    %cst = arith.constant dense<0.000000e+00> : vector<512x128xf32>
    %5 = tpu.matmul %3, %4, %cst {dimension_numbers = #tpu.dot_dimension_numbers<[1], [0], [0], [1], [0, 0, 1, 1], [], []>} : vector<512x36xbf16>, vector<36x128xbf16>, vector<512x128xf32> -> vector<512x128xf32>
    %c0_4 = arith.constant 0 : index
    %c0_5 = arith.constant 0 : index
    %6 = vector.load %arg3[%c0_4, %c0_5] : memref<1x128xf32, #tpu.memory_space<vmem>>, vector<1x128xf32>
    %cst_6 = arith.constant dense<0.000000e+00> : vector<128xf32>
    %7 = vector.multi_reduction <add>, %5, %cst_6 [0] : vector<512x128xf32> to vector<128xf32>
    %8 = vector.shape_cast %7 : vector<128xf32> to vector<1x128xf32>
    %9 = arith.addf %6, %8 : vector<1x128xf32>
    %c0_7 = arith.constant 0 : index
    %c0_8 = arith.constant 0 : index
    %10 = vector.load %arg3[%c0_7, %c0_8] : memref<1x128xf32, #tpu.memory_space<vmem>>, vector<1x128xf32>
    tpu.vector_store %arg3[%c0_7, %c0_8], %9 {strides = array<i32>} : memref<1x128xf32, #tpu.memory_space<vmem>>, vector<1x128xf32>,
    %c0_9 = arith.constant 0 : index
    %c0_10 = arith.constant 0 : index
    %11 = vector.load %arg4[%c0_9, %c0_10] : memref<1x128xf32, #tpu.memory_space<vmem>>, vector<1x128xf32>
    %12 = arith.mulf %5, %5 : vector<512x128xf32>
    %cst_11 = arith.constant dense<0.000000e+00> : vector<128xf32>
    %13 = vector.multi_reduction <add>, %12, %cst_11 [0] : vector<512x128xf32> to vector<128xf32>
    %14 = vector.shape_cast %13 : vector<128xf32> to vector<1x128xf32>
    %15 = arith.addf %11, %14 : vector<1x128xf32>
    %c0_12 = arith.constant 0 : index
    %c0_13 = arith.constant 0 : index
    %16 = vector.load %arg4[%c0_12, %c0_13] : memref<1x128xf32, #tpu.memory_space<vmem>>, vector<1x128xf32>
    tpu.vector_store %arg4[%c0_12, %c0_13], %15 {strides = array<i32>} : memref<1x128xf32, #tpu.memory_space<vmem>>, vector<1x128xf32>,
    return
  }
  func.func @transform_0(%arg0: i32) -> (i32, i32) {
    %c0_i32 = arith.constant 0 : i32
    %c0_i32_0 = arith.constant 0 : i32
    return %arg0, %c0_i32 : i32, i32
  }
  func.func @transform_1(%arg0: i32) -> (i32, i32) {
    %c0_i32 = arith.constant 0 : i32
    %c0_i32_0 = arith.constant 0 : i32
    %c0_i32_1 = arith.constant 0 : i32
    return %c0_i32, %c0_i32_0 : i32, i32
  }
  func.func @transform_2(%arg0: i32) -> (i32, i32) {
    %c0_i32 = arith.constant 0 : i32
    %c0_i32_0 = arith.constant 0 : i32
    %c0_i32_1 = arith.constant 0 : i32
    return %c0_i32, %c0_i32_0 : i32, i32
  }
  func.func @transform_3(%arg0: i32) -> (i32, i32) {
    %c0_i32 = arith.constant 0 : i32
    %c0_i32_0 = arith.constant 0 : i32
    %c0_i32_1 = arith.constant 0 : i32
    return %c0_i32, %c0_i32_0 : i32, i32
  }
}

</mosaic_0001>

<bundles_post_ra>
// kernel: tpu_custom_call.1
= control target key start
LH: loop header
LB: loop body
LE: loop exit
PB: predicated region body
PF: predicated region fallthrough
CT: control target
= control target key end

     0   :  { %9 = vsyncpa [#allocation3], 0  ;;  %vm363_vm0 = vcmask 1041408   ;;  %s1378_s0 = inlined_call_operand.vmem [shape: bf16[512,36], index: 0, kind: input, shape index: {}]   ;;  %s1379_s1 = inlined_call_operand.vmem [shape: bf16[36,128], index: 1, kind: input, shape index: {}]   ;;  %s1380_s2 = inlined_call_operand.hbm [shape: f32[1,128], index: 2, kind: output, shape index: {0}]   ;;  %s1381_s3 = inlined_call_operand.hbm [shape: f32[1,128], index: 3, kind: output, shape index: {1}]  }
   0x1   :  { %v90_v0 = vld [vmem:[%s1379_s1 + $0x10] sm:$0x3] }
   0x2   :  { %v260_v1 = vunpack.c.l.b16 %v90_v0 }
   0x3   :  { %10 = vsyncpa [#allocation5], 0  ;;  %v977_v4 = vld [vmem:[%s1379_s1 + $0x8] sm:$0xff]  ;;  %v976_v5 = vld [vmem:[%s1379_s1] sm:$0xff]  ;;  %vm266_vm1 = vcmask 293888   ;;  %s751_s28 = sshll.u32 %s1380_s2, 4  ;;  %s752_s28 = int_to_ptr.hbm [resolvable:$true] %s751_s28 }
   0x4   :  { %v263_v2 = vpack.c.b16 %v260_v1, %v260_v1  ;;  %v944_v6 = vld [vmem:[%s1378_s0] sm:$0xff]  ;;  %v945_v8 = vld [vmem:[%s1378_s0 + $0x8] sm:$0xff]  ;;  %v946_v11 = vld [vmem:[%s1378_s0 + $0x10] sm:$0xff]  ;;  %s1044_s29 = smov [#allocation4]   ;;  %s762_s6 = sshll.u32 %s1381_s3, 4  ;;  %s763_s6 = int_to_ptr.hbm [resolvable:$true] %s762_s6 }
   0x5   :  { %v952_v7 = vld [vmem:[%s1378_s0 + $0x40] sm:$0xff]  ;;  %v953_v9 = vld [vmem:[%s1378_s0 + $0x48] sm:$0xff]  ;;  %v954_v12 = vld [vmem:[%s1378_s0 + $0x50] sm:$0xff]  ;;  %s760_s30 = sshll.u32 %s1044_s29, 4  ;;  %s761_s30 = int_to_ptr.vmem [resolvable:$true] %s760_s30 }
   0x6   :  { %v365_v3 = vsel %vm363_vm0, %v263_v2, 0  ;;  %v960_v10 = vld [vmem:[%s1378_s0 + $0x80] sm:$0xff]  ;;  %v961_v13 = vld [vmem:[%s1378_s0 + $0x88] sm:$0xff]  ;;  %v947_v14 = vld [vmem:[%s1378_s0 + $0x18] sm:$0xff] }
   0x7   :  { %372 = vmatpush.bf16.msra.mxu0 %v365_v3  ;;  %978 = vmatpush.bf16.msra.mxu1 %v365_v3  ;;  %v955_v15 = vld [vmem:[%s1378_s0 + $0x58] sm:$0xff]  ;;  %v962_v16 = vld [vmem:[%s1378_s0 + $0x90] sm:$0xff]  ;;  %v968_v17 = vld [vmem:[%s1378_s0 + $0xc0] sm:$0xff] }
   0x8   :  { %979 = vmatpush.bf16.msra.mxu2 %v365_v3  ;;  %980 = vmatpush.bf16.msra.mxu3 %v365_v3  ;;  %v948_v18 = vld [vmem:[%s1378_s0 + $0x20] sm:$0xff]  ;;  %v963_v20 = vld [vmem:[%s1378_s0 + $0x98] sm:$0xff]  ;;  %v969_v21 = vld [vmem:[%s1378_s0 + $0xc8] sm:$0xff] }
   0x9   :  { %v956_v19 = vld [vmem:[%s1378_s0 + $0x60] sm:$0xff]  ;;  %v949_v22 = vld [vmem:[%s1378_s0 + $0x28] sm:$0xff]  ;;  %v970_v25 = vld [vmem:[%s1378_s0 + $0xd0] sm:$0xff] }
   0xa   :  { %v957_v23 = vld [vmem:[%s1378_s0 + $0x68] sm:$0xff]  ;;  %v964_v24 = vld [vmem:[%s1378_s0 + $0xa0] sm:$0xff]  ;;  %v950_v26 = vld [vmem:[%s1378_s0 + $0x30] sm:$0xff] }
   0xb   :  { %373 = vmatpush.bf16.msra.mxu0 %v977_v4  ;;  %981 = vmatpush.bf16.msra.mxu1 %v977_v4  ;;  %v958_v27 = vld [vmem:[%s1378_s0 + $0x70] sm:$0xff]  ;;  %v965_v28 = vld [vmem:[%s1378_s0 + $0xa8] sm:$0xff]  ;;  %v971_v29 = vld [vmem:[%s1378_s0 + $0xd8] sm:$0xff] }
   0xc   :  { %982 = vmatpush.bf16.msra.mxu2 %v977_v4  ;;  %983 = vmatpush.bf16.msra.mxu3 %v977_v4  ;;  %v951_v30 = vld [vmem:[%s1378_s0 + $0x38] sm:$0xff]  ;;  %v966_v32 = vld [vmem:[%s1378_s0 + $0xb0] sm:$0xff]  ;;  %v972_v33 = vld [vmem:[%s1378_s0 + $0xe0] sm:$0xff] }
   0xd   :  { %v959_v31 = vld [vmem:[%s1378_s0 + $0x78] sm:$0xff]  ;;  %v973_v37 = vld [vmem:[%s1378_s0 + $0xe8] sm:$0xff]  ;;  %v974_v48 = vld [vmem:[%s1378_s0 + $0xf0] sm:$0xff] }
   0xe   :  { %v967_v36 = vld [vmem:[%s1378_s0 + $0xb8] sm:$0xff] }
   0xf   :  { %374 = vmatpush.bf16.msra.mxu0 %v976_v5  ;;  %984 = vmatpush.bf16.msra.mxu1 %v976_v5  ;;  %v975_v60 = vld [vmem:[%s1378_s0 + $0xf8] sm:$0xff]  ;;  %s1043_s0 = smov [#allocation2]  }
  0x10   :  { %985 = vmatpush.bf16.msra.mxu2 %v976_v5  ;;  %986 = vmatpush.bf16.msra.mxu3 %v976_v5  ;;  %s749_s25 = sshll.u32 %s1043_s0, 4  ;;  %s750_s25 = int_to_ptr.vmem [resolvable:$true] %s749_s25 }
  0x12   :  { %912 = vmatmul.msk.bf16.vlgmr.msra.gmra.mxu0 %vm266_vm1, %v944_v6  ;;  %920 = vmatmul.msk.bf16.vlgmr.msra.gmra.mxu1 %vm266_vm1, %v952_v7 }
  0x13   :  { %928 = vmatmul.msk.bf16.vlgmr.msra.gmra.mxu2 %vm266_vm1, %v960_v10  ;;  %936 = vmatmul.msk.bf16.vlgmr.msra.gmra.mxu3 %vm266_vm1, %v968_v17 }
  0x22   :  { %913 = vmatmul.msk.bf16.gmra.mxu0 %vm266_vm1, %v945_v8  ;;  %921 = vmatmul.msk.bf16.gmra.mxu1 %vm266_vm1, %v953_v9 }
  0x23   :  { %929 = vmatmul.msk.bf16.gmra.mxu2 %vm266_vm1, %v961_v13  ;;  %937 = vmatmul.msk.bf16.gmra.mxu3 %vm266_vm1, %v969_v21 }
  0x32   :  { %914 = vmatmul.msk.bf16.gmra.mxu0 %vm266_vm1, %v946_v11  ;;  %922 = vmatmul.msk.bf16.gmra.mxu1 %vm266_vm1, %v954_v12 }
  0x33   :  { %930 = vmatmul.msk.bf16.gmra.mxu2 %vm266_vm1, %v962_v16  ;;  %938 = vmatmul.msk.bf16.gmra.mxu3 %vm266_vm1, %v970_v25 }
  0x42   :  { %915 = vmatmul.msk.bf16.gmra.mxu0 %vm266_vm1, %v947_v14  ;;  %923 = vmatmul.msk.bf16.gmra.mxu1 %vm266_vm1, %v955_v15 }
  0x43   :  { %931 = vmatmul.msk.bf16.gmra.mxu2 %vm266_vm1, %v963_v20  ;;  %939 = vmatmul.msk.bf16.gmra.mxu3 %vm266_vm1, %v971_v29 }
  0x52   :  { %916 = vmatmul.msk.bf16.gmra.mxu0 %vm266_vm1, %v948_v18  ;;  %924 = vmatmul.msk.bf16.gmra.mxu1 %vm266_vm1, %v956_v19 }
  0x53   :  { %932 = vmatmul.msk.bf16.gmra.mxu2 %vm266_vm1, %v964_v24  ;;  %940 = vmatmul.msk.bf16.gmra.mxu3 %vm266_vm1, %v972_v33 }
  0x62   :  { %917 = vmatmul.msk.bf16.gmra.mxu0 %vm266_vm1, %v949_v22  ;;  %925 = vmatmul.msk.bf16.gmra.mxu1 %vm266_vm1, %v957_v23 }
  0x63   :  { %933 = vmatmul.msk.bf16.gmra.mxu2 %vm266_vm1, %v965_v28  ;;  %941 = vmatmul.msk.bf16.gmra.mxu3 %vm266_vm1, %v973_v37 }
  0x72   :  { %918 = vmatmul.msk.bf16.gmra.mxu0 %vm266_vm1, %v950_v26  ;;  %926 = vmatmul.msk.bf16.gmra.mxu1 %vm266_vm1, %v958_v27 }
  0x73   :  { %934 = vmatmul.msk.bf16.gmra.mxu2 %vm266_vm1, %v966_v32  ;;  %942 = vmatmul.msk.bf16.gmra.mxu3 %vm266_vm1, %v974_v48 }
  0x82   :  { %919 = vmatmul.msk.bf16.gmra.mxu0 %vm266_vm1, %v951_v30  ;;  %927 = vmatmul.msk.bf16.gmra.mxu1 %vm266_vm1, %v959_v31 }
  0x83   :  { %935 = vmatmul.msk.bf16.gmra.mxu2 %vm266_vm1, %v967_v36  ;;  %943 = vmatmul.msk.bf16.gmra.mxu3 %vm266_vm1, %v975_v60 }
  0x8f   :  { %v376_v34 = vpop.f32.mrf.mxu0  ;;  %v1186_v35 = vpop.f32.mrf.mxu1 }
  0x90   :  { %v609_v39 = vmul.f32 %v376_v34, %v376_v34 }
  0x96   :  { %v1206_v56 = vpop.f32.mrf.mxu2  ;;  %v1224_v7 = vpop.f32.mrf.mxu3 }
  0x97   :  { %v378_v38 = vpop.f32.mrf.mxu0  ;;  %v1196_v42 = vpop.f32.mrf.mxu1 }
  0x98   :  { %v537_v40 = vadd.f32 %v378_v38, %v376_v34  ;;  %v610_v41 = vmul.f32 %v378_v38, %v378_v38 }
  0x9a   :  { %v673_v43 = vadd.f32 %v610_v41, %v609_v39 }
  0x9e   :  { %v1214_v63 = vpop.f32.mrf.mxu2  ;;  %v1230_v11 = vpop.f32.mrf.mxu3 }
  0x9f   :  { %v381_v44 = vpop.f32.mrf.mxu0  ;;  %v1201_v49 = vpop.f32.mrf.mxu1 }
  0xa0   :  { %v538_v45 = vadd.f32 %v537_v40, %v381_v44  ;;  %v611_v46 = vmul.f32 %v381_v44, %v381_v44 }
  0xa2   :  { %v674_v47 = vadd.f32 %v673_v43, %v611_v46 }
  0xa6   :  { %v1218_v2 = vpop.f32.mrf.mxu2  ;;  %v1236_v15 = vpop.f32.mrf.mxu3 }
  0xa7   :  { %v383_v50 = vpop.f32.mrf.mxu0  ;;  %v1204_v54 = vpop.f32.mrf.mxu1 }
  0xa8   :  { %v539_v51 = vadd.f32 %v538_v45, %v383_v50  ;;  %v612_v52 = vmul.f32 %v383_v50, %v383_v50 }
  0xaa   :  { %v675_v53 = vadd.f32 %v674_v47, %v612_v52 }
  0xae   :  { %v1222_v5 = vpop.f32.mrf.mxu2  ;;  %v1242_v19 = vpop.f32.mrf.mxu3 }
  0xaf   :  { %v386_v55 = vpop.f32.mrf.mxu0  ;;  %v1212_v62 = vpop.f32.mrf.mxu1 }
  0xb0   :  { %v540_v57 = vadd.f32 %v539_v51, %v386_v55  ;;  %v613_v58 = vmul.f32 %v386_v55, %v386_v55 }
  0xb2   :  { %v676_v59 = vadd.f32 %v675_v53, %v613_v58 }
  0xb6   :  { %v1228_v10 = vpop.f32.mrf.mxu2  ;;  %v1248_v30 = vpop.f32.mrf.mxu3 }
  0xb7   :  { %v388_v61 = vpop.f32.mrf.mxu0  ;;  %v1216_v1 = vpop.f32.mrf.mxu1 }
  0xb8   :  { %v614_v21 = vmul.f32 %v388_v61, %v388_v61  ;;  %v541_v23 = vadd.f32 %v540_v57, %v388_v61 }
  0xba   :  { %v677_v26 = vadd.f32 %v676_v59, %v614_v21 }
  0xbe   :  { %v1234_v14 = vpop.f32.mrf.mxu2  ;;  %v1254_v52 = vpop.f32.mrf.mxu3 }
  0xbf   :  { %v391_v0 = vpop.f32.mrf.mxu0  ;;  %v1220_v4 = vpop.f32.mrf.mxu1 }
  0xc0   :  { %v615_v24 = vmul.f32 %v391_v0, %v391_v0  ;;  %v542_v27 = vadd.f32 %v541_v23, %v391_v0 }
  0xc2   :  { %v678_v31 = vadd.f32 %v677_v26, %v615_v24 }
  0xc6   :  { %v1240_v18 = vpop.f32.mrf.mxu2 }
  0xc7   :  { %v393_v3 = vpop.f32.mrf.mxu0  ;;  %v1226_v8 = vpop.f32.mrf.mxu1 }
  0xc8   :  { %v616_v28 = vmul.f32 %v393_v3, %v393_v3  ;;  %v543_v32 = vadd.f32 %v542_v27, %v393_v3  ;;  %v626_v27 = vmul.f32 %v1196_v42, %v1196_v42 }
  0xca   :  { %v679_v34 = vadd.f32 %v678_v31, %v616_v28  ;;  %v627_v31 = vmul.f32 %v1201_v49, %v1201_v49 }
  0xce   :  { %v1246_v25 = vpop.f32.mrf.mxu2 }
  0xcf   :  { %v396_v6 = vpop.f32.mrf.mxu0  ;;  %v1232_v13 = vpop.f32.mrf.mxu1 }
  0xd0   :  { %v617_v33 = vmul.f32 %v396_v6, %v396_v6  ;;  %v544_v36 = vadd.f32 %v543_v32, %v396_v6 }
  0xd2   :  { %v680_v38 = vadd.f32 %v679_v34, %v617_v33  ;;  %v628_v34 = vmul.f32 %v1204_v54, %v1204_v54 }
  0xd6   :  { %v1252_v47 = vpop.f32.mrf.mxu2 }
  0xd7   :  { %v398_v9 = vpop.f32.mrf.mxu0  ;;  %v1238_v17 = vpop.f32.mrf.mxu1 }
  0xd8   :  { %v618_v37 = vmul.f32 %v398_v9, %v398_v9  ;;  %v545_v39 = vadd.f32 %v544_v36, %v398_v9 }
  0xda   :  { %v681_v43 = vadd.f32 %v680_v38, %v618_v37  ;;  %v629_v38 = vmul.f32 %v1212_v62, %v1212_v62 }
  0xde   :  { %v1256_v23 = vpop.f32.mrf.mxu2 }
  0xdf   :  { %v401_v12 = vpop.f32.mrf.mxu0  ;;  %v1244_v22 = vpop.f32.mrf.mxu1 }
  0xe0   :  { %v619_v40 = vmul.f32 %v401_v12, %v401_v12  ;;  %v546_v44 = vadd.f32 %v545_v39, %v401_v12 }
  0xe2   :  { %v682_v48 = vadd.f32 %v681_v43, %v619_v40  ;;  %v630_v43 = vmul.f32 %v1216_v1, %v1216_v1 }
  0xe6   :  { %v1275_v40 = vpop.f32.mrf.mxu2 }
  0xe7   :  { %v403_v16 = vpop.f32.mrf.mxu0  ;;  %v1250_v41 = vpop.f32.mrf.mxu1 }
  0xe8   :  { %v620_v45 = vmul.f32 %v403_v16, %v403_v16  ;;  %v547_v50 = vadd.f32 %v546_v44, %v403_v16  ;;  %v625_v16 = vmul.f32 %v1186_v35, %v1186_v35 }
  0xea   :  { %v683_v53 = vadd.f32 %v682_v48, %v620_v45 }
  0xef   :  { %v406_v20 = vpop.f32.mrf.mxu0  ;;  %v446_v6 = vpop.f32.mrf.mxu1 }
  0xf0   :  { %v621_v51 = vmul.f32 %v406_v20, %v406_v20  ;;  %v548_v55 = vadd.f32 %v547_v50, %v406_v20  ;;  %v1261_v20 = vpop.f32.mrf.mxu3 }
  0xf2   :  { %v684_v58 = vadd.f32 %v683_v53, %v621_v51  ;;  %v633_v53 = vmul.f32 %v1232_v13, %v1232_v13 }
  0xf7   :  { %v408_v29 = vpop.f32.mrf.mxu0  ;;  %v448_v37 = vpop.f32.mrf.mxu1 }
  0xf8   :  { %v622_v57 = vmul.f32 %v408_v29, %v408_v29  ;;  %v549_v59 = vadd.f32 %v548_v55, %v408_v29  ;;  %v1280_v45 = vpop.f32.mrf.mxu3 }
  0xfa   :  { %v685_v61 = vadd.f32 %v684_v58, %v622_v57  ;;  %v634_v58 = vmul.f32 %v1238_v17, %v1238_v17 }
  0xff   :  { %v411_v46 = vpop.f32.mrf.mxu0  ;;  %v451_v57 = vpop.f32.mrf.mxu1 }
 0x100   :  { %v623_v60 = vmul.f32 %v411_v46, %v411_v46  ;;  %v550_v0 = vadd.f32 %v549_v59, %v411_v46 }
 0x102   :  { %v686_v9 = vadd.f32 %v685_v61, %v623_v60  ;;  %v635_v61 = vmul.f32 %v1244_v22, %v1244_v22 }
 0x107   :  { %v413_v3 = vpop.f32.mrf.mxu0 }
 0x108   :  { %v551_v12 = vadd.f32 %v550_v0, %v413_v3  ;;  %v624_v21 = vmul.f32 %v413_v3, %v413_v3  ;;  %v1297_v3 = vpop.f32.mrf.mxu3 }
 0x10a   :  { %v552_v24 = vadd.f32 %v551_v12, %v1186_v35  ;;  %v687_v26 = vadd.f32 %v686_v9, %v624_v21 }
 0x10c   :  { %v553_v28 = vadd.f32 %v552_v24, %v1196_v42  ;;  %v688_v29 = vadd.f32 %v687_v26, %v625_v16  ;;  %v637_v16 = vmul.f32 %v446_v6, %v446_v6 }
 0x10e   :  { %v554_v32 = vadd.f32 %v553_v28, %v1201_v49  ;;  %v689_v33 = vadd.f32 %v688_v29, %v626_v27  ;;  %v638_v27 = vmul.f32 %v448_v37, %v448_v37  ;;  %v453_v28 = vpop.f32.mrf.mxu1 }
 0x110   :  { %v555_v35 = vadd.f32 %v554_v32, %v1204_v54  ;;  %v690_v36 = vadd.f32 %v689_v33, %v627_v31  ;;  %v631_v54 = vmul.f32 %v1220_v4, %v1220_v4  ;;  %v639_v32 = vmul.f32 %v451_v57, %v451_v57 }
 0x112   :  { %v556_v39 = vadd.f32 %v555_v35, %v1212_v62  ;;  %v691_v42 = vadd.f32 %v690_v36, %v628_v34  ;;  %v632_v62 = vmul.f32 %v1226_v8, %v1226_v8  ;;  %v640_v35 = vmul.f32 %v453_v28, %v453_v28  ;;  %v1302_v36 = vpop.f32.mrf.mxu3 }
 0x114   :  { %v557_v49 = vadd.f32 %v556_v39, %v1216_v1  ;;  %v692_v44 = vadd.f32 %v691_v42, %v629_v38  ;;  %v642_v39 = vmul.f32 %v1214_v63, %v1214_v63 }
 0x116   :  { %v693_v46 = vadd.f32 %v692_v44, %v630_v43  ;;  %v558_v48 = vadd.f32 %v557_v49, %v1220_v4  ;;  %v483_v4 = vpop.f32.mrf.mxu2  ;;  %v643_v43 = vmul.f32 %v1218_v2, %v1218_v2 }
 0x118   :  { %v559_v50 = vadd.f32 %v558_v48, %v1226_v8  ;;  %v694_v51 = vadd.f32 %v693_v46, %v631_v54  ;;  %v644_v54 = vmul.f32 %v1222_v5, %v1222_v5 }
 0x11a   :  { %v560_v1 = vadd.f32 %v559_v50, %v1232_v13  ;;  %v695_v55 = vadd.f32 %v694_v51, %v632_v62  ;;  %v636_v13 = vmul.f32 %v1250_v41, %v1250_v41  ;;  %v645_v62 = vmul.f32 %v1228_v10, %v1228_v10  ;;  %v1319_v51 = vpop.f32.mrf.mxu3 }
 0x11c   :  { %v561_v59 = vadd.f32 %v560_v1, %v1238_v17  ;;  %v696_v60 = vadd.f32 %v695_v55, %v633_v53  ;;  %v646_v53 = vmul.f32 %v1234_v14, %v1234_v14  ;;  %v647_v55 = vmul.f32 %v1240_v18, %v1240_v18 }
 0x11e   :  { %v562_v8 = vadd.f32 %v561_v59, %v1244_v22  ;;  %v697_v0 = vadd.f32 %v696_v60, %v634_v58  ;;  %v486_v22 = vpop.f32.mrf.mxu2  ;;  %v648_v58 = vmul.f32 %v1246_v25, %v1246_v25  ;;  %v649_v60 = vmul.f32 %v1252_v47, %v1252_v47 }
 0x120   :  { %v563_v9 = vadd.f32 %v562_v8, %v1250_v41  ;;  %v698_v12 = vadd.f32 %v697_v0, %v635_v61  ;;  %v641_v41 = vmul.f32 %v1206_v56, %v1206_v56  ;;  %v650_v0 = vmul.f32 %v1256_v23, %v1256_v23 }
 0x122   :  { %v564_v21 = vadd.f32 %v563_v9, %v446_v6  ;;  %v699_v24 = vadd.f32 %v698_v12, %v636_v13  ;;  %v651_v12 = vmul.f32 %v1275_v40, %v1275_v40 }
 0x124   :  { %v700_v17 = vadd.f32 %v699_v24, %v637_v16  ;;  %v565_v26 = vadd.f32 %v564_v21, %v448_v37  ;;  %v652_v24 = vmul.f32 %v483_v4, %v483_v4 }
 0x126   :  { %v701_v29 = vadd.f32 %v700_v17, %v638_v27  ;;  %v566_v31 = vadd.f32 %v565_v26, %v451_v57  ;;  %v653_v27 = vmul.f32 %v486_v22, %v486_v22 }
 0x128   :  { %v702_v33 = vadd.f32 %v701_v29, %v639_v32  ;;  %v567_v34 = vadd.f32 %v566_v31, %v453_v28 }
 0x12a   :  { %v568_v38 = vadd.f32 %v567_v34, %v1206_v56  ;;  %v703_v6 = vadd.f32 %v702_v33, %v640_v35  ;;  %v488_v56 = vpop.f32.mrf.mxu2 }
 0x12b   :  { %v654_v31 = vmul.f32 %v488_v56, %v488_v56 }
 0x12c   :  { %v569_v37 = vadd.f32 %v568_v38, %v1214_v63  ;;  %v704_v42 = vadd.f32 %v703_v6, %v641_v41 }
 0x12e   :  { %v570_v49 = vadd.f32 %v569_v37, %v1218_v2  ;;  %v705_v44 = vadd.f32 %v704_v42, %v642_v39 }
 0x130   :  { %v571_v46 = vadd.f32 %v570_v49, %v1222_v5  ;;  %v706_v48 = vadd.f32 %v705_v44, %v643_v43  ;;  %v659_v43 = vmul.f32 %v1236_v15, %v1236_v15 }
 0x132   :  { %v572_v50 = vadd.f32 %v571_v46, %v1228_v10  ;;  %v707_v63 = vadd.f32 %v706_v48, %v644_v54  ;;  %v1042_v54 = vmov 0.0   ;;  %v660_v46 = vmul.f32 %v1242_v19, %v1242_v19 }
 0x133   :  { %20 = vst [vmem:[#allocation2] sm:$0x1] %v1042_v54 }
 0x134   :  { %v573_v2 = vadd.f32 %v572_v50, %v1234_v14  ;;  %v708_v1 = vadd.f32 %v707_v63, %v645_v62  ;;  %v491_v14 = vpop.f32.mrf.mxu2  ;;  %21 = vst [vmem:[#allocation4] sm:$0x1] %v1042_v54 }
 0x135   :  { %v655_v34 = vmul.f32 %v491_v14, %v491_v14 }
 0x136   :  { %v709_v5 = vadd.f32 %v708_v1, %v646_v53  ;;  %v574_v57 = vadd.f32 %v573_v2, %v1240_v18  ;;  %v523_v18 = vpop.f32.mrf.mxu3  ;;  %v663_v2 = vmul.f32 %v1261_v20, %v1261_v20 }
 0x138   :  { %v575_v10 = vadd.f32 %v574_v57, %v1246_v25  ;;  %v710_v59 = vadd.f32 %v709_v5, %v647_v55  ;;  %v664_v55 = vmul.f32 %v1280_v45, %v1280_v45 }
 0x13a   :  { %v576_v61 = vadd.f32 %v575_v10, %v1252_v47  ;;  %v711_v8 = vadd.f32 %v710_v59, %v648_v58  ;;  %v666_v59 = vmul.f32 %v1302_v36, %v1302_v36 }
 0x13c   :  { %v577_v13 = vadd.f32 %v576_v61, %v1256_v23  ;;  %v712_v9 = vadd.f32 %v711_v8, %v649_v60  ;;  %v493_v32 = vpop.f32.mrf.mxu2 }
 0x13d   :  { %v656_v6 = vmul.f32 %v493_v32, %v493_v32 }
 0x13e   :  { %v578_v25 = vadd.f32 %v577_v13, %v1275_v40  ;;  %v713_v21 = vadd.f32 %v712_v9, %v650_v0  ;;  %v526_v35 = vpop.f32.mrf.mxu3  ;;  %v657_v40 = vmul.f32 %v1224_v7, %v1224_v7  ;;  %v668_v0 = vmul.f32 %v523_v18, %v523_v18 }
 0x140   :  { %v579_v16 = vadd.f32 %v578_v25, %v483_v4  ;;  %v714_v17 = vadd.f32 %v713_v21, %v651_v12 }
 0x142   :  { %v715_v26 = vadd.f32 %v714_v17, %v652_v24  ;;  %v580_v47 = vadd.f32 %v579_v16, %v486_v22  ;;  %v658_v22 = vmul.f32 %v1230_v11, %v1230_v11 }
 0x144   :  { %v716_v28 = vadd.f32 %v715_v26, %v653_v27  ;;  %v581_v29 = vadd.f32 %v580_v47, %v488_v56 }
 0x146   :  { %v717_v33 = vadd.f32 %v716_v28, %v654_v31  ;;  %v582_v23 = vadd.f32 %v581_v29, %v491_v14  ;;  %v528_v56 = vpop.f32.mrf.mxu3 }
 0x147   :  { %v670_v16 = vmul.f32 %v528_v56, %v528_v56 }
 0x148   :  { %v718_v41 = vadd.f32 %v717_v33, %v655_v34  ;;  %v583_v38 = vadd.f32 %v582_v23, %v493_v32 }
 0x14a   :  { %v584_v4 = vadd.f32 %v583_v38, %v1224_v7  ;;  %v719_v39 = vadd.f32 %v718_v41, %v656_v6  ;;  %v536_v38 = vld [vmem:[#allocation2] sm:$0x1] }
 0x14c   :  { %v585_v37 = vadd.f32 %v584_v4, %v1230_v11  ;;  %v720_v42 = vadd.f32 %v719_v39, %v657_v40  ;;  %v661_v11 = vmul.f32 %v1248_v30, %v1248_v30  ;;  %v608_v4 = vld [vmem:[#allocation4] sm:$0x1] }
 0x14e   :  { %v586_v49 = vadd.f32 %v585_v37, %v1236_v15  ;;  %v721_v44 = vadd.f32 %v720_v42, %v658_v22  ;;  %v662_v15 = vmul.f32 %v1254_v52, %v1254_v52 }
 0x150   :  { %v587_v7 = vadd.f32 %v586_v49, %v1242_v19  ;;  %v722_v48 = vadd.f32 %v721_v44, %v659_v43 }
 0x152   :  { %v588_v62 = vadd.f32 %v587_v7, %v1248_v30  ;;  %v723_v50 = vadd.f32 %v722_v48, %v660_v46  ;;  %v665_v30 = vmul.f32 %v1297_v3, %v1297_v3 }
 0x154   :  { %v589_v63 = vadd.f32 %v588_v62, %v1254_v52  ;;  %v724_v53 = vadd.f32 %v723_v50, %v661_v11  ;;  %v531_v52 = vpop.f32.mrf.mxu3 }
 0x156   :  { %v725_v1 = vadd.f32 %v724_v53, %v662_v15  ;;  %v590_v19 = vadd.f32 %v589_v63, %v1261_v20  ;;  %v667_v20 = vmul.f32 %v1319_v51, %v1319_v51 }
 0x158   :  { %v591_v5 = vadd.f32 %v590_v19, %v1280_v45  ;;  %v726_v57 = vadd.f32 %v725_v1, %v663_v2 }
 0x15a   :  { %v592_v58 = vadd.f32 %v591_v5, %v1297_v3  ;;  %v727_v10 = vadd.f32 %v726_v57, %v664_v55  ;;  %v669_v3 = vmul.f32 %v526_v35, %v526_v35 }
 0x15c   :  { %v593_v60 = vadd.f32 %v592_v58, %v1302_v36  ;;  %v728_v61 = vadd.f32 %v727_v10, %v665_v30  ;;  %v533_v24 = vpop.f32.mrf.mxu3  ;;  %v671_v36 = vmul.f32 %v531_v52, %v531_v52 }
 0x15d   :  { %v672_v28 = vmul.f32 %v533_v24, %v533_v24 }
 0x15e   :  { %v594_v8 = vadd.f32 %v593_v60, %v1319_v51  ;;  %v729_v45 = vadd.f32 %v728_v61, %v666_v59 }
 0x160   :  { %v595_v14 = vadd.f32 %v594_v8, %v523_v18  ;;  %v730_v13 = vadd.f32 %v729_v45, %v667_v20 }
 0x162   :  { %v731_v9 = vadd.f32 %v730_v13, %v668_v0  ;;  %v596_v12 = vadd.f32 %v595_v14, %v526_v35 }
 0x164   :  { %v732_v25 = vadd.f32 %v731_v9, %v669_v3  ;;  %v597_v21 = vadd.f32 %v596_v12, %v528_v56 }
 0x166   :  { %v733_v17 = vadd.f32 %v732_v25, %v670_v16  ;;  %v598_v26 = vadd.f32 %v597_v21, %v531_v52 }
 0x168   :  { %v734_v47 = vadd.f32 %v733_v17, %v671_v36  ;;  %v599_v27 = vadd.f32 %v598_v26, %v533_v24 }
 0x16a   :  { %v600_v29 = vrot.slane %v599_v27, 4  ;;  %v735_v31 = vadd.f32 %v734_v47, %v672_v28 }
 0x16c   :  { %v601_v51 = vadd.f32 %v600_v29, %v599_v27  ;;  %v736_v32 = vrot.slane %v735_v31, 4 }
 0x16e   :  { %v602_v33 = vrot.slane %v601_v51, 2  ;;  %v737_v18 = vadd.f32 %v736_v32, %v735_v31 }
 0x170   :  { %v603_v23 = vadd.f32 %v602_v33, %v601_v51  ;;  %v738_v34 = vrot.slane %v737_v18, 2 }
 0x172   :  { %v604_v41 = vrot.slane %v603_v23, 1  ;;  %v739_v35 = vadd.f32 %v738_v34, %v737_v18 }
 0x174   :  { %v605_v6 = vadd.f32 %v604_v41, %v603_v23  ;;  %v740_v40 = vrot.slane %v739_v35, 1 }
 0x176   :  { %v741_v39 = vadd.f32 %v740_v40, %v739_v35  ;;  %v606_v22 = vadd.f32 %v605_v6, %v536_v38 }
 0x178   :  { %607 = vst [vmem:[#allocation2] sm:$0x1] %v606_v22  ;;  %v742_v37 = vadd.f32 %v741_v39, %v608_v4 }
 0x179   :  { %754 = dma.vmem_to_hbm [thread:$0]  %s750_s25, 16, %s752_s28, [#allocation3]  }
 0x17a   :  { %743 = vst [vmem:[#allocation4] sm:$0x1] %v742_v37 }
 0x17b   :  { %765 = dma.vmem_to_hbm [thread:$0]  %s761_s30, 16, %s763_s6, [#allocation5]  }
 0x17c   :  { %1038 = dma.done.wait [#allocation3], 16  }
 0x17d   :  { %1039 = vsyncadd [#allocation3], 4294967280 }
 0x17e   :  { %1040 = dma.done.wait [#allocation5], 16  }
 0x17f   :  { %1041 = vsyncadd [#allocation5], 4294967280 }
 0x180   :  { %774 = vsyncpa [#allocation3], 1 }
 0x181   :  { %775 = vsyncpa [#allocation5], 1 }

</bundles_post_ra>
